<compile_context>
chip_gen: v7x
topology: tpu7x:2x2x1
jax: 0.10.0
libtpu: 0.0.40
codegen_flags: <defaults>
</compile_context>

<pallas_src>
import functools

import jax
import jax.numpy as jnp
from jax import lax
from jax.experimental import pallas as pl
from jax.experimental.pallas import tpu as pltpu


def _round_up(x, m):
    return (x + m - 1) // m * m


# ---------------------------------------------------------------------------
# Prologue kernel (runs once, no grid): contexts -> averaged embedding (B, Dp)
# One-hot "counts" matrix + a single MXU matmul replaces B*C scalar gathers.
# ---------------------------------------------------------------------------
def avg_embedding_kernel(ctx_ref, emb_ref, avg_ref):
    # ctx_ref: (B, C)     int32
    # emb_ref: (Ve, Dp)   f32/bf16 (padded embedding table, fetched once)
    # avg_ref: (B, Dp)    f32
    B, C = ctx_ref.shape
    Vp = emb_ref.shape[0]

    ctx = ctx_ref[...]                                        # (B, C) int32
    iota_v = lax.broadcasted_iota(jnp.int32, (B, Vp), 1)      # (B, Vp)
    counts = jnp.zeros((B, Vp), jnp.float32)
    for c in range(C):                                        # tiny static C
        counts = counts + (iota_v == ctx[:, c:c + 1]).astype(jnp.float32)

    # counts values are small integers (0..C): exact even in bf16.
    # Padded embedding rows (>= true V) are never selected (ids < V);
    # padded D columns are zero and fall out of the linear stage.
    avg_ref[...] = jnp.dot(counts.astype(emb_ref.dtype), emb_ref[...],
                           preferred_element_type=jnp.float32) * (1.0 / C)


# ---------------------------------------------------------------------------
# Main kernel: tiled linear over the vocab dimension.
# ---------------------------------------------------------------------------
def linear_kernel(avg_ref, wt_ref, b_ref, out_ref):
    # avg_ref: (B, Dp)        f32   resident (j-invariant)
    # wt_ref:  (Dp, TILE_V)   f32/bf16  pre-transposed weight tile (streamed)
    # b_ref:   (1, TILE_V)    f32
    # out_ref: (B, TILE_V)    f32
    acc = jnp.dot(avg_ref[...].astype(wt_ref.dtype), wt_ref[...],
                  preferred_element_type=jnp.float32)          # (B, TILE_V)
    out_ref[...] = acc + b_ref[...]


# ---------------------------------------------------------------------------
# One-time parameter preparation (weight-load time, NOT per forward call).
# ---------------------------------------------------------------------------
def prepare_cbow_params(emb_table, lin_w, lin_b, *, tile_v=2048,
                        weight_dtype=jnp.float32):
    """Pad (and pre-transpose) the parameters once.

    weight_dtype=jnp.bfloat16 is recommended on v5e/v6e (halves HBM/VMEM bytes
    for the streamed weight tiles; accumulation stays f32 in the kernels).
    """
    V, D = emb_table.shape
    d_pad = _round_up(max(D, 128), 128)
    tile_v = min(tile_v, _round_up(V, 128))   # lane-dense, multiple of 128
    v_pad = _round_up(V, tile_v)
    ve_pad = _round_up(V, 128)                # contraction dim of one-hot matmul

    emb_p = jnp.zeros((ve_pad, d_pad), weight_dtype).at[:V, :D].set(
        emb_table.astype(weight_dtype))
    # nn.Linear weight is (V, D); pre-transpose to (D, V) so each grid step is
    # a plain (B, Dp) @ (Dp, TILE_V) MXU matmul with a lane-dense N tile.
    w_t_p = jnp.zeros((d_pad, v_pad), weight_dtype).at[:D, :V].set(
        lin_w.T.astype(weight_dtype))
    b_p = jnp.zeros((1, v_pad), jnp.float32).at[0, :V].set(
        lin_b.astype(jnp.float32))
    return emb_p, w_t_p, b_p, tile_v


@functools.partial(jax.jit, static_argnames=("vocab_size", "tile_v"))
def cbow_forward(contexts, emb_p, w_t_p, b_p, *, vocab_size, tile_v):
    """contexts (B, C) int -> logits (B, vocab_size)."""
    B, C = contexts.shape
    _, d_pad = emb_p.shape
    _, v_pad = w_t_p.shape
    ctx = contexts.astype(jnp.int32)

    # Stage 1: j-invariant averaged embedding, computed exactly once.
    # TODO(synk): for production-sized V, replace this one-hot prologue with a
    # scalar-prefetch row gather (PrefetchScalarGridSpec + pl.Element) so the
    # embedding table never needs to be VMEM-resident at all.
    avg = pl.pallas_call(
        avg_embedding_kernel,
        out_shape=jax.ShapeDtypeStruct((B, d_pad), jnp.float32),
        compiler_params=pltpu.CompilerParams(
            vmem_limit_bytes=32 * 1024 * 1024),
    )(ctx, emb_p)

    # Stage 2: tiled linear over V.  Only the weight/bias/output tiles stream;
    # `avg` is a tiny resident input, so 'parallel' is megacore-safe.
    grid = (v_pad // tile_v,)
    out = pl.pallas_call(
        linear_kernel,
        out_shape=jax.ShapeDtypeStruct((B, v_pad), jnp.float32),
        grid=grid,
        in_specs=[
            pl.BlockSpec((B, d_pad), lambda j: (0, 0)),        # avg (resident)
            pl.BlockSpec((d_pad, tile_v), lambda j: (0, j)),   # W^T V-tile
            pl.BlockSpec((1, tile_v), lambda j: (0, j)),       # bias V-tile
        ],
        out_specs=pl.BlockSpec((B, tile_v), lambda j: (0, j)),
        compiler_params=pltpu.CompilerParams(
            dimension_semantics=("parallel",),   # V-tiles split across TCs
            vmem_limit_bytes=32 * 1024 * 1024,
        ),
    )(avg, w_t_p, b_p)
    return out[:, :vocab_size]


if __name__ == "__main__":
    vocab_size, embedding_dim = 128, 32
    batch, context_len = 8, 4
    # NOTE: B=8 uses only 8 MXU rows -- the kernel is inherently DMA/overhead
    # bound at this batch; stack batches in the caller if throughput matters.

    key = jax.random.PRNGKey(0)
    k_emb, k_w, k_b, k_ctx = jax.random.split(key, 4)

    # Deterministic init mirroring nn.Embedding (N(0,1)) and nn.Linear
    # (U(-1/sqrt(D), 1/sqrt(D))); weight in PyTorch's native (V, D) layout.
    emb_table = jax.random.normal(k_emb, (vocab_size, embedding_dim), jnp.float32)
    bound = 1.0 / (embedding_dim ** 0.5)
    lin_w = jax.random.uniform(
        k_w, (vocab_size, embedding_dim), jnp.float32, -bound, bound)
    lin_b = jax.random.uniform(k_b, (vocab_size,), jnp.float32, -bound, bound)

    contexts = jax.random.randint(
        k_ctx, (batch, context_len), 0, vocab_size, dtype=jnp.int32)

    # One-time weight prep (padding + transpose) outside the per-call path.
    emb_p, w_t_p, b_p, tile_v = prepare_cbow_params(
        emb_table, lin_w, lin_b, tile_v=2048, weight_dtype=jnp.float32)

    out = cbow_forward(contexts, emb_p, w_t_p, b_p,
                       vocab_size=vocab_size, tile_v=tile_v)
    out = jax.block_until_ready(out)

    # Reference (plain JAX) CBOW forward.
    ref = jnp.mean(emb_table[contexts], axis=1) @ lin_w.T + lin_b
    assert out.shape == (batch, vocab_size)
    assert jnp.allclose(out, ref, atol=1e-4, rtol=1e-4), float(
        jnp.max(jnp.abs(out - ref)))

    print("KERNEL_OK")
</pallas_src>

<mosaic_0001>
module attributes {stable_mosaic.version = 11 : i64} {
  func.func @linear_kernel(%arg0: i32, %arg1: memref<8x128xf32, #tpu.memory_space<vmem>>, %arg2: memref<128x128xf32, #tpu.memory_space<vmem>>, %arg3: memref<1x128xf32, #tpu.memory_space<vmem>>, %arg4: memref<8x128xf32, #tpu.memory_space<vmem>>) attributes {dimension_semantics = [#tpu.dimension_semantics<parallel>], iteration_bounds = array<i64: 1>, scalar_prefetch = 0 : i64, scratch_operands = 0 : i64, tpu.core_type = #tpu.core_type<tc>, window_params = [{pipeline_mode = #tpu.pipeline_mode<synchronous>, transform_indices = @transform_0, window_bounds = array<i64: 8, 128>}, {transform_indices = @transform_1, window_bounds = array<i64: 128, 128>}, {transform_indices = @transform_2, window_bounds = array<i64: 1, 128>}, {transform_indices = @transform_3, window_bounds = array<i64: 8, 128>}]} {
    %c0 = arith.constant 0 : index
    %c0_0 = arith.constant 0 : index
    %0 = vector.load %arg1[%c0, %c0_0] : memref<8x128xf32, #tpu.memory_space<vmem>>, vector<8x128xf32>
    %c0_1 = arith.constant 0 : index
    %c0_2 = arith.constant 0 : index
    %1 = vector.load %arg2[%c0_1, %c0_2] : memref<128x128xf32, #tpu.memory_space<vmem>>, vector<128x128xf32>
    %cst = arith.constant dense<0.000000e+00> : vector<8x128xf32>
    %2 = tpu.matmul %0, %1, %cst {dimension_numbers = #tpu.dot_dimension_numbers<[1], [0], [0], [1], [0, 0, 1, 1], [], []>} : vector<8x128xf32>, vector<128x128xf32>, vector<8x128xf32> -> vector<8x128xf32>
    %c0_3 = arith.constant 0 : index
    %c0_4 = arith.constant 0 : index
    %3 = vector.load %arg3[%c0_3, %c0_4] : memref<1x128xf32, #tpu.memory_space<vmem>>, vector<1x128xf32>
    %4 = vector.broadcast %3 : vector<1x128xf32> to vector<8x128xf32>
    %5 = arith.addf %2, %4 : vector<8x128xf32>
    %c0_5 = arith.constant 0 : index
    %c0_6 = arith.constant 0 : index
    %6 = vector.load %arg4[%c0_5, %c0_6] : memref<8x128xf32, #tpu.memory_space<vmem>>, vector<8x128xf32>
    tpu.vector_store %arg4[%c0_5, %c0_6], %5 {strides = array<i32>} : memref<8x128xf32, #tpu.memory_space<vmem>>, vector<8x128xf32>,
    return
  }
  func.func @transform_0(%arg0: i32) -> (i32, i32) {
    %c0_i32 = arith.constant 0 : i32
    %c0_i32_0 = arith.constant 0 : i32
    %c0_i32_1 = arith.constant 0 : i32
    return %c0_i32, %c0_i32_0 : i32, i32
  }
  func.func @transform_1(%arg0: i32) -> (i32, i32) {
    %c0_i32 = arith.constant 0 : i32
    %c0_i32_0 = arith.constant 0 : i32
    return %c0_i32, %arg0 : i32, i32
  }
  func.func @transform_2(%arg0: i32) -> (i32, i32) {
    %c0_i32 = arith.constant 0 : i32
    %c0_i32_0 = arith.constant 0 : i32
    return %c0_i32, %arg0 : i32, i32
  }
  func.func @transform_3(%arg0: i32) -> (i32, i32) {
    %c0_i32 = arith.constant 0 : i32
    %c0_i32_0 = arith.constant 0 : i32
    return %c0_i32, %arg0 : i32, i32
  }
}

module attributes {stable_mosaic.version = 11 : i64} {
  func.func @avg_embedding_kernel(%arg0: memref<8x4xi32, #tpu.memory_space<vmem>>, %arg1: memref<128x128xf32, #tpu.memory_space<vmem>>, %arg2: memref<8x128xf32, #tpu.memory_space<vmem>>) attributes {dimension_semantics = [], scalar_prefetch = 0 : i64, scratch_operands = 0 : i64, tpu.core_type = #tpu.core_type<tc>} {
    %c0 = arith.constant 0 : index
    %c0_0 = arith.constant 0 : index
    %0 = vector.load %arg0[%c0, %c0_0] : memref<8x4xi32, #tpu.memory_space<vmem>>, vector<8x4xi32>
    %1 = tpu.iota {dimensions = array<i32: 1>} : vector<8x128xi32>
    %cst = arith.constant 0.000000e+00 : f32
    %2 = vector.broadcast %cst : f32 to vector<8x128xf32>
    %3 = vector.extract_strided_slice %0 {offsets = [0, 0], sizes = [8, 1], strides = [1, 1]} : vector<8x4xi32> to vector<8x1xi32>
    %4 = vector.broadcast %3 : vector<8x1xi32> to vector<8x128xi32>
    %5 = arith.cmpi eq, %1, %4 : vector<8x128xi32>
    %6 = arith.extui %5 : vector<8x128xi1> to vector<8x128xi32>
    %7 = arith.sitofp %6 : vector<8x128xi32> to vector<8x128xf32>
    %8 = arith.addf %2, %7 : vector<8x128xf32>
    %9 = vector.extract_strided_slice %0 {offsets = [0, 1], sizes = [8, 1], strides = [1, 1]} : vector<8x4xi32> to vector<8x1xi32>
    %10 = vector.broadcast %9 : vector<8x1xi32> to vector<8x128xi32>
    %11 = arith.cmpi eq, %1, %10 : vector<8x128xi32>
    %12 = arith.extui %11 : vector<8x128xi1> to vector<8x128xi32>
    %13 = arith.sitofp %12 : vector<8x128xi32> to vector<8x128xf32>
    %14 = arith.addf %8, %13 : vector<8x128xf32>
    %15 = vector.extract_strided_slice %0 {offsets = [0, 2], sizes = [8, 1], strides = [1, 1]} : vector<8x4xi32> to vector<8x1xi32>
    %16 = vector.broadcast %15 : vector<8x1xi32> to vector<8x128xi32>
    %17 = arith.cmpi eq, %1, %16 : vector<8x128xi32>
    %18 = arith.extui %17 : vector<8x128xi1> to vector<8x128xi32>
    %19 = arith.sitofp %18 : vector<8x128xi32> to vector<8x128xf32>
    %20 = arith.addf %14, %19 : vector<8x128xf32>
    %21 = vector.extract_strided_slice %0 {offsets = [0, 3], sizes = [8, 1], strides = [1, 1]} : vector<8x4xi32> to vector<8x1xi32>
    %22 = vector.broadcast %21 : vector<8x1xi32> to vector<8x128xi32>
    %23 = arith.cmpi eq, %1, %22 : vector<8x128xi32>
    %24 = arith.extui %23 : vector<8x128xi1> to vector<8x128xi32>
    %25 = arith.sitofp %24 : vector<8x128xi32> to vector<8x128xf32>
    %26 = arith.addf %20, %25 : vector<8x128xf32>
    %c0_1 = arith.constant 0 : index
    %c0_2 = arith.constant 0 : index
    %27 = vector.load %arg1[%c0_1, %c0_2] : memref<128x128xf32, #tpu.memory_space<vmem>>, vector<128x128xf32>
    %cst_3 = arith.constant dense<0.000000e+00> : vector<8x128xf32>
    %28 = tpu.matmul %26, %27, %cst_3 {dimension_numbers = #tpu.dot_dimension_numbers<[1], [0], [0], [1], [0, 0, 1, 1], [], []>} : vector<8x128xf32>, vector<128x128xf32>, vector<8x128xf32> -> vector<8x128xf32>
    %cst_4 = arith.constant 2.500000e-01 : f32
    %29 = vector.broadcast %cst_4 : f32 to vector<8x128xf32>
    %30 = arith.mulf %28, %29 : vector<8x128xf32>
    %c0_5 = arith.constant 0 : index
    %c0_6 = arith.constant 0 : index
    %31 = vector.load %arg2[%c0_5, %c0_6] : memref<8x128xf32, #tpu.memory_space<vmem>>, vector<8x128xf32>
    tpu.vector_store %arg2[%c0_5, %c0_6], %30 {strides = array<i32>} : memref<8x128xf32, #tpu.memory_space<vmem>>, vector<8x128xf32>,
    return
  }
}

</mosaic_0001>

<bundles_post_ra>
// kernel: cbow_forward.3
= control target key start
LH: loop header
LB: loop body
LE: loop exit
PB: predicated region body
PF: predicated region fallthrough
CT: control target
= control target key end

     0   :  { %v229_v3 = vmov 0.0|0.0   ;;  %vm230_vm0 = vmmov 0   ;;  %v231_v6 = vmov 0.0   ;;  %s319_s0 = inlined_call_operand.vmem [shape: f32[8,128], index: 0, kind: input, shape index: {}]   ;;  %s320_s1 = inlined_call_operand.vmem [shape: f32[128,128], index: 1, kind: input, shape index: {}]   ;;  %s321_s2 = inlined_call_operand.vmem [shape: f32[1,128], index: 2, kind: input, shape index: {}]   ;;  %s322_s3 = inlined_call_operand.hbm [shape: f32[8,128], index: 3, kind: output, shape index: {}]  }
   0x1   :  { %v16_v0 = vld [vmem:[%s320_s1] sm:$0xff]  ;;  %v17_v1 = vld [vmem:[%s320_s1 + $0x8] sm:$0xff]  ;;  %v18_v2 = vld [vmem:[%s320_s1 + $0x10] sm:$0xff]  ;;  %177 = vmatprep.subr.bf16.mxu0 %v229_v3  ;;  %174 = vmatprep.mubr.msk.f32.mxu0 %vm230_vm0, %v231_v6 }
   0x2   :  { %v178_v4 = vpack.c.bf16 %v17_v1, %v16_v0  ;;  %v19_v5 = vld [vmem:[%s320_s1 + $0x18] sm:$0xff]  ;;  %v20_v8 = vld [vmem:[%s320_s1 + $0x20] sm:$0xff]  ;;  %v21_v9 = vld [vmem:[%s320_s1 + $0x28] sm:$0xff] }
   0x3   :  { %v181_v7 = vpack.c.bf16 %v19_v5, %v18_v2 }
   0x4   :  { %179 = vmatpush3.bf16.msra.mxu0 %v178_v4 }
   0x5   :  { %180 = vmatprep.subr.bf16.mxu0 %v229_v3 }
   0x6   :  { %8 = vsyncpa [#allocation3], 0  ;;  %v184_v10 = vpack.c.bf16 %v21_v9, %v20_v8  ;;  %v22_v11 = vld [vmem:[%s320_s1 + $0x30] sm:$0xff]  ;;  %v23_v12 = vld [vmem:[%s320_s1 + $0x38] sm:$0xff]  ;;  %s232_s21 = smov [#allocation2]  }
   0x7   :  { %v187_v13 = vpack.c.bf16 %v23_v12, %v22_v11  ;;  %v24_v14 = vld [vmem:[%s320_s1 + $0x40] sm:$0xff]  ;;  %v25_v15 = vld [vmem:[%s320_s1 + $0x48] sm:$0xff]  ;;  %v26_v17 = vld [vmem:[%s320_s1 + $0x50] sm:$0xff]  ;;  %s116_s22 = sshll.u32 %s232_s21, 4  ;;  %s117_s22 = int_to_ptr.vmem [resolvable:$true] %s116_s22 }
   0x8   :  { %182 = vmatpush3.bf16.msra.mxu0 %v181_v7  ;;  %v190_v16 = vpack.c.bf16 %v25_v15, %v24_v14  ;;  %v27_v18 = vld [vmem:[%s320_s1 + $0x58] sm:$0xff]  ;;  %v28_v20 = vld [vmem:[%s320_s1 + $0x60] sm:$0xff]  ;;  %v29_v21 = vld [vmem:[%s320_s1 + $0x68] sm:$0xff]  ;;  %p210_p1 = scmp.lt.s32.totalorder %s117_s22, %s117_s22 }
   0x9   :  { %183 = vmatprep.subr.bf16.mxu0 %v229_v3  ;;  %v193_v19 = vpack.c.bf16 %v27_v18, %v26_v17  ;;  %v196_v22 = vpack.c.bf16 %v29_v21, %v28_v20  ;;  %v30_v23 = vld [vmem:[%s320_s1 + $0x70] sm:$0xff]  ;;  %v31_v24 = vld [vmem:[%s320_s1 + $0x78] sm:$0xff]  ;;  %v15_v26 = vld [vmem:[%s319_s0] sm:$0xff]  ;;  %s205_s1 = scalar_lea.vmem %s117_s22, 128 }
   0xa   :  { %v199_v25 = vpack.c.bf16 %v31_v24, %v30_v23  ;;  %v124_v27 = vld [vmem:[%s321_s2] ss:$0 sm:$0xff]  ;;  %p206_p0 = scmp.ne.s32.totalorder %s117_s22, %s205_s1  ;;  %p211_p2 = scmp.lt.s32.totalorder %s205_s1, %s205_s1 }
   0xc   :  { %185 = vmatpush3.bf16.msra.mxu0 %v184_v10  ;;  %p212_p3 = por %p211_p2, %p210_p1 }
   0xd   :  { %186 = vmatprep.subr.bf16.mxu0 %v229_v3 }
   0xe   :  { %p213_p4 = pnand %p212_p3, %p206_p0 }
  0x10   :  { %188 = vmatpush3.bf16.msra.mxu0 %v187_v13 }
  0x11   :  { %189 = vmatprep.subr.bf16.mxu0 %v229_v3 }
  0x14   :  { %191 = vmatpush3.bf16.msra.mxu0 %v190_v16 }
  0x15   :  { %192 = vmatprep.subr.bf16.mxu0 %v229_v3 }
  0x18   :  { %194 = vmatpush3.bf16.msra.mxu0 %v193_v19 }
  0x19   :  { %195 = vmatprep.subr.bf16.mxu0 %v229_v3 }
  0x1c   :  { %197 = vmatpush3.bf16.msra.mxu0 %v196_v22 }
  0x1d   :  { %198 = vmatprep.subr.bf16.mxu0 %v229_v3 }
  0x20   :  { %200 = vmatpush3.bf16.msra.mxu0 %v199_v25 }
  0x23   :  { %175 = vmatmul.mubr.f32.vlgmr.msra.gmra.mrb[0].mxu0 %v15_v26 }
  0xf6   :  { %v105_v28 = vpop.f32.mrb[0].mxu0 }
  0xf7   :  { %v106_v29 = vadd.f32 %v124_v27, %v105_v28  ;;  %v176_v30 = vpop.f32.mrb[1].mxu0 }
  0xf9   :  { %109 = vst [vmem:[#allocation2] sm:$0xff] %v106_v29 }
  0xfa   :  { %216 = shalt.err (!%p213_p4)
}
  0xfb   :  { %s217_s24 = scalar_lea.hbm %s322_s3, 128 }
  0xfc   :  { %p218_p5 = scmp.ne.s32.totalorder %s322_s3, %s217_s24  ;;  %p221_p6 = scmp.lt.u32.totalorder %s217_s24, %s322_s3 }
  0xfe   :  { %p223_p7 = pnand %p221_p6, %p218_p5 }
 0x100   :  { %226 = shalt.err (!%p223_p7)
}
 0x101   :  { %119 = dma.vmem_to_hbm [thread:$0]  %s117_s22, 128, %s322_s3, [#allocation3]  }
 0x102   :  { %227 = dma.done.wait [#allocation3], 128  }
 0x103   :  { %228 = vsyncadd [#allocation3], 4294967168 }
 0x104   :  { %123 = vsyncpa [#allocation3], 1 }

// kernel: cbow_forward.2
= control target key start
LH: loop header
LB: loop body
LE: loop exit
PB: predicated region body
PF: predicated region fallthrough
CT: control target
= control target key end

     0   :  { %7 = vsyncpa [#allocation3], 0  ;;  %s268_s9 = smov [#allocation2]   ;;  %s311_s0 = inlined_call_operand.vmem [shape: s32[8,4], index: 0, kind: input, shape index: {}]   ;;  %s312_s1 = inlined_call_operand.hbm [shape: f32[128,128], index: 1, kind: input, shape index: {}]   ;;  %s313_s2 = inlined_call_operand.vmem [shape: f32[8,128], index: 2, kind: output, shape index: {}]  }
   0x1   :  { %s15_s10 = sshll.u32 %s268_s9, 4  ;;  %s244_s13 = scalar_lea.hbm %s312_s1, 2048  ;;  %s16_s10 = int_to_ptr.vmem [resolvable:$true] %s15_s10 }
   0x2   :  { %p245_p0 = scmp.ne.s32.totalorder %s312_s1, %s244_s13  ;;  %p248_p1 = scmp.lt.u32.totalorder %s244_s13, %s312_s1 }
   0x4   :  { %p250_p2 = pnand %p248_p1, %p245_p0 }
   0x6   :  { %253 = shalt.err (!%p250_p2)
}
   0x7   :  { %s254_s18 = scalar_lea.vmem %s16_s10, 2048  ;;  %p259_p4 = scmp.lt.s32.totalorder %s16_s10, %s16_s10 }
   0x8   :  { %p255_p3 = scmp.ne.s32.totalorder %s16_s10, %s254_s18  ;;  %p260_p5 = scmp.lt.s32.totalorder %s254_s18, %s254_s18 }
   0xa   :  { %p261_p6 = por %p260_p5, %p259_p4 }
   0xc   :  { %p262_p7 = pnand %p261_p6, %p255_p3 }
   0xe   :  { %265 = shalt.err (!%p262_p7)
}
   0xf   :  { %s269_s19 = smov 128   ;;  %s270_s20 = smov 8  }
  0x10   :  { %21 = dma.hbm_to_vmem [thread:$0]  %s312_s1, 2048, %s16_s10, [#allocation3], %s269_s19, %s269_s19, %s270_s20  }
  0x11   :  { %266 = dma.done.wait [#allocation3], 2048  }
  0x12   :  { %267 = vsyncadd [#allocation3], 4294965248  ;;  %v271_v0 = vmov 0   ;;  %v272_v1 = vmov 2   ;;  %v273_v2 = vmov 0.0|0.0   ;;  %v25_v3 = vld [vmem:[%s311_s0] sm:$0xff]  ;;  %v26_v31 = vlaneseq }
  0x13   :  { %239 = vset.pattern.permute.xlu0 %v271_v0  ;;  %241 = vset.pattern.permute.xlu1 %v272_v1  ;;  %v56_v4 = vld [vmem:[#allocation2] sm:$0xff]  ;;  %v57_v5 = vld [vmem:[#allocation2 + $0x8] sm:$0xff]  ;;  %v58_v7 = vld [vmem:[#allocation2 + $0x10] sm:$0xff]  ;;  %v274_v12 = vmov 1   ;;  %v275_v13 = vmov 3   ;;  %vm276_vm0 = vmmov 0  }
  0x14   :  { %205 = vmatprep.subr.bf16.mxu0 %v273_v2  ;;  %29 = vperm.xlu0 %239, %v25_v3   ;;  %v206_v6 = vpack.c.bf16 %v57_v5, %v56_v4  ;;  %v59_v8 = vld [vmem:[#allocation2 + $0x18] sm:$0xff]  ;;  %v60_v10 = vld [vmem:[#allocation2 + $0x20] sm:$0xff]  ;;  %v61_v11 = vld [vmem:[#allocation2 + $0x28] sm:$0xff]  ;;  %v277_v20 = vmov 0.0   ;;  %v27_v32 = vand.u32 127, %v26_v31 }
  0x15   :  { %43 = vperm.xlu1 %241, %v25_v3   ;;  %v209_v9 = vpack.c.bf16 %v59_v8, %v58_v7  ;;  %v212_v14 = vpack.c.bf16 %v61_v11, %v60_v10  ;;  %v62_v15 = vld [vmem:[#allocation2 + $0x30] sm:$0xff]  ;;  %v63_v16 = vld [vmem:[#allocation2 + $0x38] sm:$0xff]  ;;  %v64_v18 = vld [vmem:[#allocation2 + $0x40] sm:$0xff]  ;;  %202 = vmatprep.mubr.msk.f32.mxu0 %vm276_vm0, %v277_v20 }
  0x16   :  { %207 = vmatpush3.bf16.msra.mxu0 %v206_v6  ;;  %v215_v17 = vpack.c.bf16 %v63_v16, %v62_v15  ;;  %v65_v19 = vld [vmem:[#allocation2 + $0x48] sm:$0xff]  ;;  %v66_v22 = vld [vmem:[#allocation2 + $0x50] sm:$0xff]  ;;  %v67_v23 = vld [vmem:[#allocation2 + $0x58] sm:$0xff] }
  0x17   :  { %208 = vmatprep.subr.bf16.mxu0 %v273_v2  ;;  %v218_v21 = vpack.c.bf16 %v65_v19, %v64_v18  ;;  %v221_v24 = vpack.c.bf16 %v67_v23, %v66_v22  ;;  %v68_v25 = vld [vmem:[#allocation2 + $0x60] sm:$0xff]  ;;  %v69_v26 = vld [vmem:[#allocation2 + $0x68] sm:$0xff]  ;;  %v70_v28 = vld [vmem:[#allocation2 + $0x70] sm:$0xff] }
  0x18   :  { %240 = vset.pattern.permute.xlu0 %v274_v12  ;;  %v224_v27 = vpack.c.bf16 %v69_v26, %v68_v25  ;;  %v71_v29 = vld [vmem:[#allocation2 + $0x78] sm:$0xff] }
  0x19   :  { %242 = vset.pattern.permute.xlu1 %v275_v13  ;;  %36 = vperm.xlu0 %240, %v25_v3   ;;  %v227_v30 = vpack.c.bf16 %v71_v29, %v70_v28 }
  0x1a   :  { %50 = vperm.xlu1 %242, %v25_v3   ;;  %210 = vmatpush3.bf16.msra.mxu0 %v209_v9 }
  0x1b   :  { %211 = vmatprep.subr.bf16.mxu0 %v273_v2 }
  0x1d   :  { %243 = vset.pattern.permute.xlu0 %v275_v13 }
  0x1e   :  { %213 = vmatpush3.bf16.msra.mxu0 %v212_v14 }
  0x1f   :  { %214 = vmatprep.subr.bf16.mxu0 %v273_v2 }
  0x22   :  { %216 = vmatpush3.bf16.msra.mxu0 %v215_v17 }
  0x23   :  { %217 = vmatprep.subr.bf16.mxu0 %v273_v2 }
  0x26   :  { %219 = vmatpush3.bf16.msra.mxu0 %v218_v21 }
  0x27   :  { %220 = vmatprep.subr.bf16.mxu0 %v273_v2 }
  0x2a   :  { %222 = vmatpush3.bf16.msra.mxu0 %v221_v24 }
  0x2b   :  { %223 = vmatprep.subr.bf16.mxu0 %v273_v2 }
  0x2e   :  { %225 = vmatpush3.bf16.msra.mxu0 %v224_v27 }
  0x2f   :  { %226 = vmatprep.subr.bf16.mxu0 %v273_v2 }
  0x32   :  { %228 = vmatpush3.bf16.msra.mxu0 %v227_v30 }
  0x93   :  { %v30_v33 = vpop.permute.xlu0 %29 }
  0x94   :  { %v44_v34 = vpop.permute.xlu1 %43  ;;  %vm31_vm1 = vcmp.eq.s32.totalorder %v27_v32, %v30_v33 }
  0x95   :  { %vm45_vm2 = vcmp.eq.s32.totalorder %v27_v32, %v44_v34  ;;  %v149_v37 = vsel %vm31_vm1, 1.0, %v277_v20 }
  0x96   :  { %v151_v40 = vsel %vm45_vm2, 1.0, %v277_v20 }
  0x98   :  { %v37_v35 = vpop.permute.xlu0 %36 }
  0x99   :  { %v51_v36 = vpop.permute.xlu1 %50  ;;  %vm38_vm3 = vcmp.eq.s32.totalorder %v27_v32, %v37_v35 }
  0x9a   :  { %vm52_vm4 = vcmp.eq.s32.totalorder %v27_v32, %v51_v36  ;;  %v150_v38 = vsel %vm38_vm3, 1.0, %v277_v20 }
  0x9b   :  { %v41_v39 = vadd.f32 %v150_v38, %v149_v37  ;;  %v152_v41 = vsel %vm52_vm4, 1.0, %v277_v20 }
  0x9d   :  { %v48_v42 = vadd.f32 %v151_v40, %v41_v39 }
  0x9f   :  { %v55_v43 = vadd.f32 %v152_v41, %v48_v42 }
  0xa1   :  { %203 = vmatmul.mubr.f32.vlgmr.msra.gmra.mrb[0].mxu0 %v55_v43 }
 0x174   :  { %v138_v44 = vpop.f32.mrb[0].mxu0 }
 0x175   :  { %v142_v45 = vmul.f32 0.25, %v138_v44  ;;  %v204_v46 = vpop.f32.mrb[1].mxu0 }
 0x177   :  { %143 = vst [vmem:[%s313_s2] sm:$0xff] %v142_v45 }
 0x178   :  { %148 = vsyncpa [#allocation3], 1 }

</bundles_post_ra>
